<compile_context>
chip_gen: v5e
topology: v5e:2x2
jax: 0.10.0
libtpu: 0.0.40
codegen_flags: <defaults>
</compile_context>

<pallas_src>
import jax
import jax.numpy as jnp
import numpy as np
from jax.experimental import pallas as pl
from jax.experimental.pallas import tpu as pltpu

EPS = 1e-5
LRELU_SLOPE = 0.2
STATS_DTYPE = jnp.bfloat16              # MXU feed dtype for the statistics pass
VMEM_LIMIT_BYTES = 32 * 1024 * 1024     # conservative budget: fits v5e/v6e/v7x


# ----------------------------------------------------------------------------
# Host-side constant builders (weight/shape-only folding)
# ----------------------------------------------------------------------------
def _up_pad_matrix(s):
    """Matrix M (2s+2, s): 2x bilinear upsample (align_corners=False) followed
    by ReplicationPad(1), as a linear map along one spatial axis."""
    s2 = 2 * s
    m = np.zeros((s2 + 2, s), dtype=np.float32)
    for hp in range(s2 + 2):
        h2 = min(max(hp - 1, 0), s2 - 1)          # replication pad
        src = max((h2 + 0.5) / 2.0 - 0.5, 0.0)    # bilinear source coordinate
        i0 = int(np.floor(src))
        frac = src - i0
        i1 = min(i0 + 1, s - 1)
        m[hp, i0] += 1.0 - frac
        m[hp, i1] += frac
    return m


def _pick_blocks(n_imgs, h2, lanes, min_steps=4, max_out_block_bytes=4 << 20):
    """Choose (NB images, TH conv rows) per grid step.

    Goals: big blocks (amortize the ~0.4us per-step cost, large DMA transfers)
    but >= min_steps total steps so both v7x TensorCores get >= 2 pipelined
    steps (and v5e/v6e get any pipelining at all), and a modest f32 output slab
    so double-buffering fits VMEM.  Divisor-preserving so no ragged blocks
    contaminate the BatchNorm statistics."""
    nb_opts = [d for d in range(n_imgs, 0, -1) if n_imgs % d == 0]
    th_opts = [d for d in range(h2, 0, -1)
               if h2 % d == 0 and (d == h2 or d % 8 == 0)]

    def steps(nb, th):
        return (n_imgs // nb) * (h2 // th)

    nb, th = 1, h2
    for cand in nb_opts:                       # batch as many images as possible
        if steps(cand, th) >= min_steps:
            nb = cand
            break
    if steps(nb, th) < min_steps:              # N too small: tile the conv rows
        for cand in th_opts:
            th = cand
            if steps(nb, th) >= min_steps:
                break
    # VMEM guard: keep the (double-buffered) f32 output slab modest.
    while nb > 1 and nb * th * lanes * 4 > max_out_block_bytes:
        nb = next(d for d in nb_opts if d < nb)
    while th > th_opts[-1] and nb * th * lanes * 4 > max_out_block_bytes:
        th = next(d for d in th_opts if d < th)
    return nb, th


# ----------------------------------------------------------------------------
# Shared in-kernel helper: fused upsample + pad + 3x3 conv for one image,
# restricted to the TH output rows selected by this grid step's a3 block.
# ----------------------------------------------------------------------------
def _conv_rows(x, a3_ref, ck_ref):
    """Reassociated fused conv:  acc += a3[kh] @ (x @ ck[kh]).

      x @ ck[kh]   : (H, W*Cin) @ (W*Cin, W2*Cout) -> lane-dense (H, W2*Cout)
      a3[kh] @ ... : (TH, H)    @ (H, W2*Cout)     -> lane-dense (TH, W2*Cout)

    Inputs may be bf16 (statistics pass) or f32 (output pass); accumulation is
    always f32 via preferred_element_type."""
    th = a3_ref.shape[1]
    lanes = ck_ref.shape[2]
    acc = jnp.zeros((th, lanes), jnp.float32)
    for kh in range(3):                        # 3 row taps, fully unrolled
        u = jnp.dot(x, ck_ref[kh, :, :], preferred_element_type=jnp.float32)
        acc = acc + jnp.dot(a3_ref[kh, :, :], u.astype(x.dtype),
                            preferred_element_type=jnp.float32)
    return acc


# ----------------------------------------------------------------------------
# Pass 1: BatchNorm partial statistics only (conv is NOT written to HBM).
# Emits, per (image, row-block), lane-dense [per-lane sum ; per-lane
# mean-centred sum of squares] so the wrapper can combine them with the
# numerically robust parallel-variance formula.
# ----------------------------------------------------------------------------
def stats_kernel(x_ref, a3_ref, ck_ref, stats_ref):
    nb = x_ref.shape[0]
    th = a3_ref.shape[1]
    inv_th = 1.0 / th
    for b in range(nb):                        # static unrolled batch block
        acc = _conv_rows(x_ref[b, :, :], a3_ref, ck_ref)      # (TH, lanes) f32
        s1 = jnp.sum(acc, axis=0, keepdims=True)              # (1, lanes)
        d = acc - s1 * inv_th
        m2 = jnp.sum(d * d, axis=0, keepdims=True)            # (1, lanes)
        stats_ref[b, 0] = jnp.concatenate([s1, m2], axis=0)   # (2, lanes)


# ----------------------------------------------------------------------------
# Pass 2: recompute the fused conv (f32), apply the precomputed per-channel
# BN affine (scale/shift tiled across the W2*Cout lanes) and LeakyReLU(0.2);
# lane-dense unmasked stores.
# ----------------------------------------------------------------------------
def conv_bn_lrelu_kernel(x_ref, a3_ref, ck_ref, scale_ref, shift_ref, out_ref):
    nb = x_ref.shape[0]
    for b in range(nb):
        acc = _conv_rows(x_ref[b, :, :], a3_ref, ck_ref)      # (TH, lanes) f32
        z = acc * scale_ref[...] + shift_ref[...]
        out_ref[b, :, :] = jnp.where(z >= 0, z, LRELU_SLOPE * z)


# ----------------------------------------------------------------------------
# Wrapper (public interface NCHW, like PyTorch)
# ----------------------------------------------------------------------------
def unet_up_forward(x_nchw, w_oihw, bias, gamma, beta):
    # bias is intentionally unused: training-mode BatchNorm subtracts the batch
    # mean right after the conv, so a per-channel bias cancels exactly in this
    # forward output (it only matters for running-stat bookkeeping, see TODO).
    del bias
    n, cin, h, w = x_nchw.shape
    cout = w_oihw.shape[0]
    h2, w2 = 2 * h, 2 * w
    lanes = w2 * cout

    # TODO(synk): in an end-to-end NHWC model these wrapper transposes vanish;
    # the output one re-reads/re-writes the largest tensor and is the next item
    # after the in-kernel work, but the NCHW public interface forces it here.
    x2d = jnp.transpose(x_nchw, (0, 2, 3, 1)).astype(jnp.float32)
    x2d = x2d.reshape(n, h, w * cin)                       # lane-dense view

    # --- fold upsample+pad+conv into small constant operators ---------------
    a_mat = _up_pad_matrix(h)                              # (H2+2, H)
    b_mat = _up_pad_matrix(w)                              # (W2+2, W)
    a3 = jnp.asarray(np.stack([a_mat[k:k + h2] for k in range(3)], 0))  # (3,H2,H)
    bs = np.stack([b_mat[k:k + w2] for k in range(3)], 0)               # (3,W2,W)
    w_t = jnp.transpose(w_oihw.astype(jnp.float32), (2, 3, 1, 0))       # kh,kw,ci,co
    # ck[kh][w*Cin+ci, w2*Cout+co] = sum_kw B[w2+kw, w] * w[kh, kw, ci, co]
    ck = jnp.einsum('kvw,hkio->hwivo', jnp.asarray(bs), w_t,
                    precision=jax.lax.Precision.HIGHEST)
    ck = ck.reshape(3, w * cin, lanes)                     # (3, W*Cin, W2*Cout)

    nb, th = _pick_blocks(n, h2, lanes)
    gn, gh = n // nb, h2 // th
    grid = (gn, gh)

    # --- explicit VMEM budget (inputs/outputs are double-buffered) ----------
    need = 2 * 4 * (nb * h * w * cin          # x block
                    + 3 * th * h              # a3 block
                    + 3 * w * cin * lanes     # ck (largest; grows ~ W^2*Cin*Cout)
                    + 2 * lanes               # scale/shift rows
                    + nb * th * lanes         # output block
                    + nb * 2 * lanes)         # stats block
    # TODO(synk): lane-tile ck (3rd grid axis over the W2*Cout lanes) before
    # scaling H/W/C past this budget (v7x has only 64 MiB physical VMEM).
    assert need <= VMEM_LIMIT_BYTES, (need, VMEM_LIMIT_BYTES)

    cparams = pltpu.CompilerParams(
        dimension_semantics=("parallel", "parallel"),
        vmem_limit_bytes=VMEM_LIMIT_BYTES)

    x_spec = pl.BlockSpec((nb, h, w * cin), lambda i, j: (i, 0, 0))
    a3_spec = pl.BlockSpec((3, th, h), lambda i, j: (0, j, 0))
    ck_spec = pl.BlockSpec((3, w * cin, lanes), lambda i, j: (0, 0, 0))
    row_spec = pl.BlockSpec((1, lanes), lambda i, j: (0, 0))

    # --- pass 1: BN partial statistics (bf16 MXU feed, f32 accumulation) ----
    # (when gh > 1 the small lane-operator matmul, M=H, is recomputed per row
    #  block; acceptable since the MXU is far from the bottleneck at K=16/64.)
    stats = pl.pallas_call(
        stats_kernel,
        out_shape=jax.ShapeDtypeStruct((n, gh, 2, lanes), jnp.float32),
        grid=grid,
        in_specs=[x_spec, a3_spec, ck_spec],
        out_specs=pl.BlockSpec((nb, 1, 2, lanes), lambda i, j: (i, j, 0, 0)),
        compiler_params=cparams,
    )(x2d.astype(STATS_DTYPE), a3.astype(STATS_DTYPE), ck.astype(STATS_DTYPE))

    # --- tiny wrapper reduction: robust parallel-variance combine -----------
    m_total = n * h2 * w2
    st = stats.reshape(n, gh, 2, w2, cout)
    part_mean = st[:, :, 0] / th                            # (N, GH, W2, Cout)
    part_m2 = st[:, :, 1]
    mean = jnp.mean(part_mean, axis=(0, 1, 2))              # (Cout,)
    var = (jnp.sum(part_m2, axis=(0, 1, 2))
           + th * jnp.sum((part_mean - mean) ** 2, axis=(0, 1, 2))) / m_total
    scale = gamma.astype(jnp.float32) * jax.lax.rsqrt(var + EPS)
    shift = beta.astype(jnp.float32) - mean * scale
    scale_row = jnp.tile(scale, (w2,)).reshape(1, lanes)
    shift_row = jnp.tile(shift, (w2,)).reshape(1, lanes)
    # TODO(synk): BatchNorm2d running_mean/running_var momentum bookkeeping is
    # training-state only and does not affect this forward output.

    # --- pass 2: recompute conv (f32) + BN affine + LeakyReLU ---------------
    out = pl.pallas_call(
        conv_bn_lrelu_kernel,
        out_shape=jax.ShapeDtypeStruct((n, h2, lanes), jnp.float32),
        grid=grid,
        in_specs=[x_spec, a3_spec, ck_spec, row_spec, row_spec],
        out_specs=pl.BlockSpec((nb, th, lanes), lambda i, j: (i, j, 0)),
        compiler_params=cparams,
    )(x2d, a3, ck, scale_row, shift_row)

    out = out.reshape(n, h2, w2, cout)                      # free row-major view
    return jnp.transpose(out, (0, 3, 1, 2))                 # back to NCHW


# ----------------------------------------------------------------------------
# Pure-JAX reference (PyTorch semantics, including the conv bias)
# ----------------------------------------------------------------------------
def ref_forward(x_nchw, w_oihw, bias, gamma, beta):
    x = jnp.transpose(x_nchw, (0, 2, 3, 1)).astype(jnp.float32)
    N, H, W, Cin = x.shape

    def idx(size_in, size_out):
        o = jnp.arange(size_out, dtype=jnp.float32)
        src = jnp.maximum((o + 0.5) / 2.0 - 0.5, 0.0)
        i0 = jnp.floor(src).astype(jnp.int32)
        i1 = jnp.minimum(i0 + 1, size_in - 1)
        return i0, i1, src - i0

    i0, i1, fh = idx(H, 2 * H)
    j0, j1, fw = idx(W, 2 * W)
    xr = x[:, i0] * (1 - fh)[None, :, None, None] + x[:, i1] * fh[None, :, None, None]
    y = xr[:, :, j0] * (1 - fw)[None, None, :, None] + xr[:, :, j1] * fw[None, None, :, None]

    xp = jnp.pad(y, ((0, 0), (1, 1), (1, 1), (0, 0)), mode='edge')
    w_hwio = jnp.transpose(w_oihw, (2, 3, 1, 0))
    conv = jax.lax.conv_general_dilated(
        xp, w_hwio, (1, 1), 'VALID',
        dimension_numbers=('NHWC', 'HWIO', 'NHWC'),
        precision=jax.lax.Precision.HIGHEST) + bias.reshape(1, 1, 1, -1)
    mean = conv.mean(axis=(0, 1, 2), keepdims=True)
    var = ((conv - mean) ** 2).mean(axis=(0, 1, 2), keepdims=True)
    z = (conv - mean) / jnp.sqrt(var + EPS) * gamma.reshape(1, 1, 1, -1) \
        + beta.reshape(1, 1, 1, -1)
    z = jnp.where(z > 0, z, LRELU_SLOPE * z)
    return jnp.transpose(z, (0, 3, 1, 2))


if __name__ == "__main__":
    # UnetUp('DIP', input_channel=4, output_channel=8,
    #        upsample_mode='bilinear', ln_lambda=0)
    N, Cin, Cout, H, W = 2, 4, 8, 16, 16

    key = jax.random.PRNGKey(0)
    kx, kw, kb = jax.random.split(key, 3)
    x = jax.random.normal(kx, (N, Cin, H, W), dtype=jnp.float32)

    # Conv2d(4, 8, 3) params (PyTorch-style uniform bound)
    fan_in = Cin * 3 * 3
    bound = 1.0 / jnp.sqrt(float(fan_in))
    w_oihw = jax.random.uniform(kw, (Cout, Cin, 3, 3), jnp.float32, -bound, bound)
    bias = jax.random.uniform(kb, (Cout,), jnp.float32, -bound, bound)
    # BatchNorm2d affine params (PyTorch default init)
    gamma = jnp.ones((Cout,), jnp.float32)
    beta = jnp.zeros((Cout,), jnp.float32)

    out = unet_up_forward(x, w_oihw, bias, gamma, beta)
    out = jax.block_until_ready(out)
    assert out.shape == (N, Cout, 2 * H, 2 * W), out.shape

    ref = jax.block_until_ready(ref_forward(x, w_oihw, bias, gamma, beta))
    assert jnp.allclose(out, ref, atol=1e-3, rtol=1e-3), \
        float(jnp.max(jnp.abs(out - ref)))

    print("KERNEL_OK")
</pallas_src>

<mosaic_0001>
module attributes {stable_mosaic.version = 11 : i64} {
  func.func @stats_kernel(%arg0: i32, %arg1: i32, %arg2: memref<1x16x64xbf16, #tpu.memory_space<vmem>>, %arg3: memref<3x16x16xbf16, #tpu.memory_space<vmem>>, %arg4: memref<3x64x256xbf16, #tpu.memory_space<vmem>>, %arg5: memref<1x1x2x256xf32, #tpu.memory_space<vmem>>) attributes {dimension_semantics = [#tpu.dimension_semantics<parallel>, #tpu.dimension_semantics<parallel>], iteration_bounds = array<i64: 2, 2>, scalar_prefetch = 0 : i64, scratch_operands = 0 : i64, tpu.core_type = #tpu.core_type<tc>, window_params = [{transform_indices = @transform_0, window_bounds = array<i64: 1, 16, 64>}, {transform_indices = @transform_1, window_bounds = array<i64: 3, 16, 16>}, {pipeline_mode = #tpu.pipeline_mode<synchronous>, transform_indices = @transform_2, window_bounds = array<i64: 3, 64, 256>}, {transform_indices = @transform_3, window_bounds = array<i64: 1, 1, 2, 256>}]} {
    %c0 = arith.constant 0 : index
    %c0_0 = arith.constant 0 : index
    %c0_1 = arith.constant 0 : index
    %0 = vector.load %arg2[%c0, %c0_0, %c0_1] : memref<1x16x64xbf16, #tpu.memory_space<vmem>>, vector<1x16x64xbf16>
    %1 = vector.shape_cast %0 : vector<1x16x64xbf16> to vector<16x64xbf16>
    %cst = arith.constant 0.000000e+00 : f32
    %2 = vector.broadcast %cst : f32 to vector<16x256xf32>
    %c0_2 = arith.constant 0 : index
    %c0_3 = arith.constant 0 : index
    %c0_4 = arith.constant 0 : index
    %3 = vector.load %arg4[%c0_2, %c0_3, %c0_4] : memref<3x64x256xbf16, #tpu.memory_space<vmem>>, vector<1x64x256xbf16>
    %4 = vector.shape_cast %3 : vector<1x64x256xbf16> to vector<64x256xbf16>
    %cst_5 = arith.constant dense<0.000000e+00> : vector<16x256xf32>
    %5 = tpu.matmul %1, %4, %cst_5 {dimension_numbers = #tpu.dot_dimension_numbers<[1], [0], [0], [1], [0, 0, 1, 1], [], []>} : vector<16x64xbf16>, vector<64x256xbf16>, vector<16x256xf32> -> vector<16x256xf32>
    %c0_6 = arith.constant 0 : index
    %c0_7 = arith.constant 0 : index
    %c0_8 = arith.constant 0 : index
    %6 = vector.load %arg3[%c0_6, %c0_7, %c0_8] : memref<3x16x16xbf16, #tpu.memory_space<vmem>>, vector<1x16x16xbf16>
    %7 = vector.shape_cast %6 : vector<1x16x16xbf16> to vector<16x16xbf16>
    %8 = arith.truncf %5 : vector<16x256xf32> to vector<16x256xbf16>
    %cst_9 = arith.constant dense<0.000000e+00> : vector<16x256xf32>
    %9 = tpu.matmul %7, %8, %cst_9 {dimension_numbers = #tpu.dot_dimension_numbers<[1], [0], [0], [1], [0, 0, 1, 1], [], []>} : vector<16x16xbf16>, vector<16x256xbf16>, vector<16x256xf32> -> vector<16x256xf32>
    %10 = arith.addf %2, %9 : vector<16x256xf32>
    %c1 = arith.constant 1 : index
    %c0_10 = arith.constant 0 : index
    %c0_11 = arith.constant 0 : index
    %11 = vector.load %arg4[%c1, %c0_10, %c0_11] : memref<3x64x256xbf16, #tpu.memory_space<vmem>>, vector<1x64x256xbf16>
    %12 = vector.shape_cast %11 : vector<1x64x256xbf16> to vector<64x256xbf16>
    %cst_12 = arith.constant dense<0.000000e+00> : vector<16x256xf32>
    %13 = tpu.matmul %1, %12, %cst_12 {dimension_numbers = #tpu.dot_dimension_numbers<[1], [0], [0], [1], [0, 0, 1, 1], [], []>} : vector<16x64xbf16>, vector<64x256xbf16>, vector<16x256xf32> -> vector<16x256xf32>
    %c1_13 = arith.constant 1 : index
    %c0_14 = arith.constant 0 : index
    %c0_15 = arith.constant 0 : index
    %14 = vector.load %arg3[%c1_13, %c0_14, %c0_15] : memref<3x16x16xbf16, #tpu.memory_space<vmem>>, vector<1x16x16xbf16>
    %15 = vector.shape_cast %14 : vector<1x16x16xbf16> to vector<16x16xbf16>
    %16 = arith.truncf %13 : vector<16x256xf32> to vector<16x256xbf16>
    %cst_16 = arith.constant dense<0.000000e+00> : vector<16x256xf32>
    %17 = tpu.matmul %15, %16, %cst_16 {dimension_numbers = #tpu.dot_dimension_numbers<[1], [0], [0], [1], [0, 0, 1, 1], [], []>} : vector<16x16xbf16>, vector<16x256xbf16>, vector<16x256xf32> -> vector<16x256xf32>
    %18 = arith.addf %10, %17 : vector<16x256xf32>
    %c2 = arith.constant 2 : index
    %c0_17 = arith.constant 0 : index
    %c0_18 = arith.constant 0 : index
    %19 = vector.load %arg4[%c2, %c0_17, %c0_18] : memref<3x64x256xbf16, #tpu.memory_space<vmem>>, vector<1x64x256xbf16>
    %20 = vector.shape_cast %19 : vector<1x64x256xbf16> to vector<64x256xbf16>
    %cst_19 = arith.constant dense<0.000000e+00> : vector<16x256xf32>
    %21 = tpu.matmul %1, %20, %cst_19 {dimension_numbers = #tpu.dot_dimension_numbers<[1], [0], [0], [1], [0, 0, 1, 1], [], []>} : vector<16x64xbf16>, vector<64x256xbf16>, vector<16x256xf32> -> vector<16x256xf32>
    %c2_20 = arith.constant 2 : index
    %c0_21 = arith.constant 0 : index
    %c0_22 = arith.constant 0 : index
    %22 = vector.load %arg3[%c2_20, %c0_21, %c0_22] : memref<3x16x16xbf16, #tpu.memory_space<vmem>>, vector<1x16x16xbf16>
    %23 = vector.shape_cast %22 : vector<1x16x16xbf16> to vector<16x16xbf16>
    %24 = arith.truncf %21 : vector<16x256xf32> to vector<16x256xbf16>
    %cst_23 = arith.constant dense<0.000000e+00> : vector<16x256xf32>
    %25 = tpu.matmul %23, %24, %cst_23 {dimension_numbers = #tpu.dot_dimension_numbers<[1], [0], [0], [1], [0, 0, 1, 1], [], []>} : vector<16x16xbf16>, vector<16x256xbf16>, vector<16x256xf32> -> vector<16x256xf32>
    %26 = arith.addf %18, %25 : vector<16x256xf32>
    %cst_24 = arith.constant dense<0.000000e+00> : vector<256xf32>
    %27 = vector.multi_reduction <add>, %26, %cst_24 [0] : vector<16x256xf32> to vector<256xf32>
    %28 = vector.shape_cast %27 : vector<256xf32> to vector<1x256xf32>
    %cst_25 = arith.constant 6.250000e-02 : f32
    %29 = vector.broadcast %cst_25 : f32 to vector<1x256xf32>
    %30 = arith.mulf %28, %29 : vector<1x256xf32>
    %31 = vector.broadcast %30 : vector<1x256xf32> to vector<16x256xf32>
    %32 = arith.subf %26, %31 : vector<16x256xf32>
    %33 = arith.mulf %32, %32 : vector<16x256xf32>
    %cst_26 = arith.constant dense<0.000000e+00> : vector<256xf32>
    %34 = vector.multi_reduction <add>, %33, %cst_26 [0] : vector<16x256xf32> to vector<256xf32>
    %35 = vector.shape_cast %34 : vector<256xf32> to vector<1x256xf32>
    %36 = tpu.concatenate %28, %35 in 0 : vector<1x256xf32>, vector<1x256xf32> -> vector<2x256xf32>
    %c0_27 = arith.constant 0 : index
    %c0_28 = arith.constant 0 : index
    %c0_29 = arith.constant 0 : index
    %c0_30 = arith.constant 0 : index
    %37 = vector.load %arg5[%c0_27, %c0_28, %c0_29, %c0_30] : memref<1x1x2x256xf32, #tpu.memory_space<vmem>>, vector<1x1x2x256xf32>
    %38 = vector.shape_cast %37 : vector<1x1x2x256xf32> to vector<2x256xf32>
    %39 = vector.shape_cast %36 : vector<2x256xf32> to vector<1x1x2x256xf32>
    tpu.vector_store %arg5[%c0_27, %c0_28, %c0_29, %c0_30], %39 {strides = array<i32>} : memref<1x1x2x256xf32, #tpu.memory_space<vmem>>, vector<1x1x2x256xf32>,
    return
  }
  func.func @transform_0(%arg0: i32, %arg1: i32) -> (i32, i32, i32) {
    %c0_i32 = arith.constant 0 : i32
    %c0_i32_0 = arith.constant 0 : i32
    %c0_i32_1 = arith.constant 0 : i32
    return %arg0, %c0_i32, %c0_i32_0 : i32, i32, i32
  }
  func.func @transform_1(%arg0: i32, %arg1: i32) -> (i32, i32, i32) {
    %c0_i32 = arith.constant 0 : i32
    %c0_i32_0 = arith.constant 0 : i32
    %c0_i32_1 = arith.constant 0 : i32
    return %c0_i32, %arg1, %c0_i32_0 : i32, i32, i32
  }
  func.func @transform_2(%arg0: i32, %arg1: i32) -> (i32, i32, i32) {
    %c0_i32 = arith.constant 0 : i32
    %c0_i32_0 = arith.constant 0 : i32
    %c0_i32_1 = arith.constant 0 : i32
    %c0_i32_2 = arith.constant 0 : i32
    return %c0_i32, %c0_i32_0, %c0_i32_1 : i32, i32, i32
  }
  func.func @transform_3(%arg0: i32, %arg1: i32) -> (i32, i32, i32, i32) {
    %c0_i32 = arith.constant 0 : i32
    %c0_i32_0 = arith.constant 0 : i32
    %c0_i32_1 = arith.constant 0 : i32
    return %arg0, %arg1, %c0_i32, %c0_i32_0 : i32, i32, i32, i32
  }
}

</mosaic_0001>

<bundles_post_ra>
// kernel: tpu_custom_call.1
= control target key start
LH: loop header
LB: loop body
LE: loop exit
PB: predicated region body
PF: predicated region fallthrough
CT: control target
= control target key end

     0   :  { %s1478_s0 = inlined_call_operand.vmem [shape: bf16[2,16,64], index: 0, kind: input, shape index: {}]   ;;  %s1479_s1 = inlined_call_operand.vmem [shape: bf16[3,32,16], index: 1, kind: input, shape index: {}]   ;;  %s1480_s2 = inlined_call_operand.hbm [shape: bf16[3,64,256], index: 2, kind: input, shape index: {}]   ;;  %s1481_s3 = inlined_call_operand.hbm [shape: f32[2,2,2,256], index: 3, kind: output, shape index: {}]  }
   0x1   :  { %1484 = sst [smem:[#allocation11_spill]] %s1480_s2 }
   0x2   :  { %8 = vsyncpa [#allocation4], 0 }
   0x3   :  { %9 = vsyncpa [#allocation5], 0 }
   0x4   :  { %11 = vsyncpa [#allocation5 + $0x1], 0  ;;  %s1271_s12 = smov 0   ;;  %s1273_s13 = smov 0  }
   0x5   :  { %s1275_s14 = smov 0   ;;  %s1277_s15 = smov 0  }
   0x6   :  { %s1279_s16 = smov 0   ;;  %s1281_s17 = smov 0  }
   0x7   :  { %s1283_s18 = smov 0   ;;  %s1285_s19 = smov 0  }
   0x8   :  { %s1287_s20 = smov 0   ;;  %s1289_s21 = smov 0  }
   0x9 LB: > { %s824_s22 = sadd.s32 4294967295, %s1246_s21   ;;  %s825_s23 = sadd.s32 4294967294, %s1246_s21   ;;  %s1246_s21 = sphi %s1289_s21, %s17_s21   ;;  %s1242_s20 = sphi %s1287_s20, %s1503_s20   ;;  %s1238_s19 = sphi %s1285_s19, %s1502_s19   ;;  %s1234_s18 = sphi %s1283_s18, %s1501_s18   ;;  %s1230_s17 = sphi %s1281_s17, %s1500_s17   ;;  %s1226_s16 = sphi %s1279_s16, %s1499_s16   ;;  %s1222_s15 = sphi %s1277_s15, %s1498_s15   ;;  %s1218_s14 = sphi %s1275_s14, %s1497_s14   ;;  %s1214_s13 = sphi %s1273_s13, %s1496_s13   ;;  %s1210_s12 = sphi %s1271_s12, %s1495_s12  }
   0xa   : > { %s26_s24 = sadd.s32 1, %s1238_s19  ;;  %s29_s25 = sadd.s32 1, %s1242_s20 }
   0xb   : > { %p27_p0 = scmp.ge.s32.totalorder %s26_s24, 2  ;;  %s62_s26 = sadd.s32 1, %s1226_s16 }
   0xc   : > { %p69_p1 = scmp.ne.s32.totalorder %s1226_s16, %s1222_s15  ;;  %p70_p2 = scmp.eq.s32.totalorder %s1246_s21, 0 }
   0xd   : > { %s1505_s24 = smov (%p27_p0, %s26_s24), 0  ;;  %s1507_s25 = smov (!%p27_p0, %s29_s25), %s1242_s20 }
   0xe   : > { %1485 = sst [smem:[#allocation9_spill]] %s1505_s24  ;;  %s59_s27 = ssub.s32 %s1238_s19, %s1505_s24 }
   0xf   : > { %p1334_p3 = por %p70_p2, %p69_p1  ;;  %p31_p4 = scmp.ge.s32.totalorder %s1507_s25, 2 }
  0x10   : > { %p60_p5 = scmp.eq.s32.totalorder %s59_s27, 0  ;;  %s111_s29 = sadd.s32 1, %s1218_s14 }
  0x11   : > { %p121_p6 = scmp.ne.s32.totalorder %s1218_s14, %s1214_s13  ;;  %s1509_s25 = smov (%p31_p4, %s1507_s25), 0 }
  0x12   : > { %1487 = sst [smem:[#allocation10_spill]] %s1509_s25  ;;  %s106_s4 = ssub.s32 %s1242_s20, %s1509_s25 }
  0x13   : > { %s1344_s30 = scalar_select %p60_p5, %s1226_s16, %s62_s26  }
  0x14   : > { %p122_p7 = scmp.eq.s32.totalorder %s824_s22, 3  ;;  %s108_s5 = sor.u32 %s106_s4, %s59_s27 }
  0x15   : > { %p127_p8 = scmp.ne.s32.totalorder %s1214_s13, %s1210_s12  ;;  %p109_p9 = scmp.eq.s32.totalorder %s108_s5, 0 }
  0x16   : > { %p1350_p10 = por %p122_p7, %p121_p6  ;;  %p128_p11 = scmp.eq.s32.totalorder %s825_s23, 3 }
  0x17   : > { %p826_p12 = scmp.ge.s32.totalorder %s1246_s21, 1  ;;  %p135_p0 = scmp.lt.s32.totalorder %s1246_s21, 5 }
  0x18   : > { %s1356_s7 = scalar_select %p109_p9, %s1218_s14, %s111_s29  }
  0x19   : > { %p1358_p13 = por %p128_p11, %p127_p8  ;;  %p1363_p1 = scmp.eq.s32.totalorder %s824_s22, 0 }
  0x1a   : > { %p1367_p2 = pnand %p826_p12, %p135_p0  ;;  %s1492_s2 = sld [smem:[#allocation11_spill]] }
  0x1b   : > { %s1248_s27 = smov [#allocation3]   ;;  %s1249_s22 = smov 128  }
  0x1c   : > { %p1008_p4 = pneg %p1367_p2  ;;  %s148_s29 = sshll.u32 %s1248_s27, 4  ;;  %s149_s29 = int_to_ptr.vmem [resolvable:$true] %s148_s29 }
  0x1d   : > { %s1250_s4 = smov 8   ;;  %p828_p6 = scmp.ge.s32.totalorder %s1246_s21, 4 }
  0x1e   : > { %p1009_p5 = pnand %p1363_p1, %p1008_p4 }
  0x1f   : > { %158 = sbr.rel (%p828_p6) target bundleno = 43 (0x2b), region = 20 }
  0x20   : > { %s146_s23 = sshll.u32 %s1492_s2, 4  ;;  %s147_s23 = int_to_ptr.hbm [resolvable:$true] %s146_s23 }
  0x21   : > { %1011 = dma.hbm_to_vmem [thread:$0]  (!%p1009_p5), %s147_s23, 3072, %s149_s29, [#allocation4], %s1249_s22, %s1249_s22, %s1250_s4  }
  0x24   : > { %169 = sbr.rel (!%p1334_p3) target bundleno = 43 (0x2b), region = 28  ;;  %s171_s5 = sand.u32 (%p1334_p3), 1, %s1226_s16  }
  0x25   : > { %s970_s11 = sshll.u32 (%p1334_p3), %s1238_s19, 3  ;;  %s1000_s26 = smul.u32 (%p1334_p3), 24, %s171_s5 }
  0x26   : > { %s176_s27 = scalar_lea.vmem (%p1334_p3), %s1479_s1, %s970_s11 }
  0x27   : > { %v193_v0 = vld [vmem:[%s176_s27] sm:$0xff] (%p1334_p3)   ;;  %v197_v1 = vld [vmem:[%s176_s27 + $0x10] sm:$0xff] (%p1334_p3)   ;;  %s173_s24 = scalar_lea.vmem (%p1334_p3), [#allocation2], %s1000_s26 }
  0x28   : > { %v201_v2 = vld [vmem:[%s176_s27 + $0x20] sm:$0xff] (%p1334_p3)   ;;  %194 = vst [vmem:[%s173_s24] sm:$0xff] (%p1334_p3), %v193_v0  }
  0x29   : > { %198 = vst [vmem:[%s173_s24 + $0x8] sm:$0xff] %v197_v1  }
  0x2a   : > { %202 = vst [vmem:[%s173_s24 + $0x10] sm:$0xff] %v201_v2  }
  0x2b PF: > { %243 = sbr.rel (%p1367_p2) target bundleno = 553 (0x229), region = 69  ;;  %s246_s28 = sand.u32 (!%p1367_p2), 1, %s1222_s15  }
  0x2c   : > { %s1001_s23 = smul.u32 (!%p1367_p2), 24, %s246_s28 }
  0x2e   : > { %s1389_s29 = scalar_lea.vmem (!%p1367_p2), [#allocation2], %s1001_s23 }
  0x30   : > { %1201 = dma.done.wait (%p1363_p1), [#allocation4], 3072  }
  0x31   : > { %1203 = vsyncadd (%p1363_p1), [#allocation4], 4294964224  ;;  %p279_p3 = scmp.lt.s32.totalorder %s1234_s18, 1  ;;  %v866_v3 = vld [vmem:[#allocation3 + $0x30] sm:$0xf]  ;;  %vm341_vm0 = vcmask 523264  }
  0x32   : > { %v980_v4 = vld [vmem:[#allocation3 + $0x34] sm:$0xf0]  ;;  %v979_v5 = vld [vmem:[#allocation3 + $0x34] sm:$0xf]  ;;  %v868_v7 = vld [vmem:[#allocation3 + $0x38] sm:$0xf0] }
  0x33   : > { %s1397_s2 = scalar_select %p279_p3, %s1234_s18, 1  ;;  %v867_v6 = vor.u32 %v980_v4, %v866_v3  ;;  %v900_v8 = vld [vmem:[#allocation3 + $0x70] sm:$0xf]  ;;  %v989_v9 = vld [vmem:[#allocation3 + $0x74] sm:$0xf0]  ;;  %v871_v10 = vor.u32 %v979_v5, %v868_v7  ;;  %vm464_vm1 = vcmask 130048  }
  0x34   : > { %v901_v11 = vor.u32 %v989_v9, %v900_v8  ;;  %v988_v12 = vld [vmem:[#allocation3 + $0x74] sm:$0xf]  ;;  %v902_v13 = vld [vmem:[#allocation3 + $0x78] sm:$0xf0]  ;;  %v858_v14 = vld [vmem:[#allocation3 + $0x20] sm:$0xf] }
  0x35   : > { %s971_s24 = sshll.u32 %s1397_s2, 3  ;;  %349 = vmatpush.bf16.msra.mxu0 %v867_v6  ;;  %v905_v15 = vor.u32 %v988_v12, %v902_v13  ;;  %v978_v16 = vld [vmem:[#allocation3 + $0x24] sm:$0xf0]  ;;  %v977_v17 = vld [vmem:[#allocation3 + $0x24] sm:$0xf]  ;;  %363 = vmatpush.bf16.msra.mxu1 %v871_v10  ;;  %v990_v9 = vld [vmem:[%s1389_s29 + $0x8] sm:$0xff] }
  0x36   : > { %v860_v18 = vld [vmem:[#allocation3 + $0x28] sm:$0xf0]  ;;  %430 = vmatpush.bf16.msra.mxu2 %v901_v11  ;;  %v859_v19 = vor.u32 %v978_v16, %v858_v14  ;;  %v892_v21 = vld [vmem:[#allocation3 + $0x60] sm:$0xf]  ;;  %v987_v22 = vld [vmem:[#allocation3 + $0x64] sm:$0xf0]  ;;  %s283_s9 = scalar_lea.vmem %s1478_s0, %s971_s24 }
  0x37   : > { %v863_v20 = vor.u32 %v977_v17, %v860_v18  ;;  %v986_v23 = vld [vmem:[#allocation3 + $0x64] sm:$0xf]  ;;  %444 = vmatpush.bf16.msra.mxu3 %v905_v15  ;;  %v893_v24 = vor.u32 %v987_v22, %v892_v21  ;;  %v894_v25 = vld [vmem:[#allocation3 + $0x68] sm:$0xf0]  ;;  %v850_v26 = vld [vmem:[#allocation3 + $0x10] sm:$0xf] }
  0x38   : > { %v976_v27 = vld [vmem:[#allocation3 + $0x14] sm:$0xf0]  ;;  %v897_v28 = vor.u32 %v986_v23, %v894_v25  ;;  %v975_v29 = vld [vmem:[#allocation3 + $0x14] sm:$0xf]  ;;  %v852_v30 = vld [vmem:[#allocation3 + $0x18] sm:$0xf0] }
  0x39   : > { %v884_v31 = vld [vmem:[#allocation3 + $0x50] sm:$0xf]  ;;  %350 = vmatpush.bf16.msra.mxu0 %v859_v19  ;;  %v851_v32 = vor.u32 %v976_v27, %v850_v26  ;;  %v985_v33 = vld [vmem:[#allocation3 + $0x54] sm:$0xf0]  ;;  %v984_v34 = vld [vmem:[#allocation3 + $0x54] sm:$0xf]  ;;  %364 = vmatpush.bf16.msra.mxu1 %v863_v20  ;;  %v855_v36 = vor.u32 %v975_v29, %v852_v30 }
  0x3a   : > { %v886_v35 = vld [vmem:[#allocation3 + $0x58] sm:$0xf0]  ;;  %431 = vmatpush.bf16.msra.mxu2 %v893_v24  ;;  %v885_v37 = vor.u32 %v985_v33, %v884_v31  ;;  %v842_v38 = vld [vmem:[#allocation3] sm:$0xf]  ;;  %v974_v39 = vld [vmem:[#allocation3 + $0x4] sm:$0xf0] }
  0x3b   : > { %v973_v40 = vld [vmem:[#allocation3 + $0x4] sm:$0xf]  ;;  %445 = vmatpush.bf16.msra.mxu3 %v897_v28  ;;  %v889_v41 = vor.u32 %v984_v34, %v886_v35  ;;  %v844_v42 = vld [vmem:[#allocation3 + $0x8] sm:$0xf0]  ;;  %v876_v43 = vld [vmem:[#allocation3 + $0x40] sm:$0xf]  ;;  %v843_v47 = vor.u32 %v974_v39, %v842_v38 }
  0x3c   : > { %v983_v44 = vld [vmem:[#allocation3 + $0x44] sm:$0xf0]  ;;  %v982_v45 = vld [vmem:[#allocation3 + $0x44] sm:$0xf]  ;;  %v878_v46 = vld [vmem:[#allocation3 + $0x48] sm:$0xf0]  ;;  %v847_v48 = vor.u32 %v973_v40, %v844_v42 }
  0x3d   : > { %351 = vmatpush.bf16.msra.mxu0 %v851_v32  ;;  %365 = vmatpush.bf16.msra.mxu1 %v855_v36  ;;  %v877_v49 = vor.u32 %v983_v44, %v876_v43  ;;  %v881_v50 = vor.u32 %v982_v45, %v878_v46  ;;  %v1405_v51 = vld [vmem:[%s283_s9] sm:$0xff]  ;;  %v998_v62 = vld [vmem:[#allocation3 + $0xb4] sm:$0xf0]  ;;  %v950_v0 = vld [vmem:[#allocation3 + $0xb8] sm:$0xf0]  ;;  %s965_s10 = sshll.u32 %s1230_s17, 1 }
  0x3e   : > { %432 = vmatpush.bf16.msra.mxu2 %v885_v37  ;;  %v981_v60 = vld [vmem:[%s1389_s29] sm:$0xff]  ;;  %v940_v6 = vld [vmem:[#allocation3 + $0xa0] sm:$0xf]  ;;  %v995_v10 = vld [vmem:[#allocation3 + $0xa4] sm:$0xf]  ;;  %s966_s22 = sshll.u32 %s1234_s18, 2 }
  0x3f   : > { %446 = vmatpush.bf16.msra.mxu3 %v889_v41  ;;  %v948_v61 = vld [vmem:[#allocation3 + $0xb0] sm:$0xf]  ;;  %v997_v63 = vld [vmem:[#allocation3 + $0xb4] sm:$0xf]  ;;  %v996_v7 = vld [vmem:[#allocation3 + $0xa4] sm:$0xf0]  ;;  %s714_s5 = sadd.s32 %s966_s22, %s965_s10 }
  0x40   : > { %v949_v2 = vor.u32 %v998_v62, %v948_v61  ;;  %v953_v5 = vor.u32 %v997_v63, %v950_v0  ;;  %v942_v11 = vld [vmem:[#allocation3 + $0xa8] sm:$0xf0]  ;;  %v941_v12 = vor.u32 %v996_v7, %v940_v6  ;;  %v932_v14 = vld [vmem:[#allocation3 + $0x90] sm:$0xf]  ;;  %v994_v15 = vld [vmem:[#allocation3 + $0x94] sm:$0xf0] }
  0x41   : > { %352 = vmatpush.bf16.msra.mxu0 %v843_v47  ;;  %366 = vmatpush.bf16.msra.mxu1 %v847_v48  ;;  %v945_v13 = vor.u32 %v995_v10, %v942_v11  ;;  %v993_v16 = vld [vmem:[#allocation3 + $0x94] sm:$0xf]  ;;  %v934_v17 = vld [vmem:[#allocation3 + $0x98] sm:$0xf0]  ;;  %v933_v18 = vor.u32 %v994_v15, %v932_v14  ;;  %v924_v20 = vld [vmem:[#allocation3 + $0x80] sm:$0xf] }
  0x42   : > { %433 = vmatpush.bf16.msra.mxu2 %v877_v49  ;;  %v937_v19 = vor.u32 %v993_v16, %v934_v17  ;;  %v992_v21 = vld [vmem:[#allocation3 + $0x84] sm:$0xf0]  ;;  %v991_v22 = vld [vmem:[#allocation3 + $0x84] sm:$0xf]  ;;  %v926_v23 = vld [vmem:[#allocation3 + $0x88] sm:$0xf0] }
  0x43   : > { %447 = vmatpush.bf16.msra.mxu3 %v881_v50  ;;  %v925_v24 = vor.u32 %v992_v21, %v924_v20  ;;  %v929_v25 = vor.u32 %v991_v22, %v926_v23  ;;  %v999_v36 = vld [vmem:[%s1389_s29 + $0x10] sm:$0xff]  ;;  %s276_s4 = sand.u32 1, %s1214_s13   ;;  %s967_s26 = sshll.u32 %s714_s5, 1  ;;  %vm692_vm2 = vcmask 1040384   ;;  %vm698_vm3 = vcmask 1041408  }
  0x44   : > { %872 = vmatmul.msk.bf16.vlgmr.msra.gmra.mxu0 %vm341_vm0, %v1405_v51  ;;  %873 = vmatmul.msk.bf16.vlgmr.msra.gmra.mxu1 %vm341_vm0, %v1405_v51  ;;  %s833_s11 = sshll.u32 %s276_s4, 2  ;;  %s716_s23 = scalar_lea.hbm %s1481_s3, %s967_s26 }
  0x45   : > { %906 = vmatmul.msk.bf16.vlgmr.msra.gmra.mxu2 %vm341_vm0, %v1405_v51  ;;  %s278_s17 = scalar_lea.vmem [#allocation6], %s833_s11  ;;  %s720_s29 = sshll.u32 %s716_s23, 4  ;;  %s721_s29 = int_to_ptr.hbm [resolvable:$true] %s720_s29 }
  0x46   : > { %907 = vmatmul.msk.bf16.vlgmr.msra.gmra.mxu3 %vm341_vm0, %v1405_v51  ;;  %s718_s18 = sshll.u32 %s278_s17, 4  ;;  %s703_s2 = scalar_lea.sflag [#allocation5], %s276_s4  ;;  %s719_s18 = int_to_ptr.vmem [resolvable:$true] %s718_s18 }
  0x47   : > { %s1146_s24 = sshra.s32 %s721_s29, 4  ;;  %s1152_s10 = scalar_lea.hbm %s1481_s3, 16  ;;  %s1147_s24 = int_to_ptr.hbm [resolvable:$true] %s1146_s24 }
  0x48   : > { %s1148_s15 = scalar_lea.hbm %s1147_s24, 4  ;;  %p1153_p11 = scmp.lt.s32.totalorder %s1147_s24, %s1481_s3 }
  0x49   : > { %p1149_p7 = scmp.ne.s32.totalorder %s1147_s24, %s1148_s15  ;;  %p1154_p12 = scmp.lt.s32.totalorder %s1152_s10, %s1148_s15 }
  0x4b   : > { %p1150_p8 = pnand %p1149_p7, %p1350_p10  ;;  %p1155_p0 = por %p1154_p12, %p1153_p11 }
  0x4d   : > { %p1151_p9 = pneg %p1150_p8 }
  0x4f   : > { %p1156_p1 = pnand %p1155_p0, %p1151_p9 }
  0xc1   : > { %v354_v52 = vpop.f32.mrf.mxu0  ;;  %v368_v53 = vpop.f32.mrf.mxu1 }
  0xc8   : > { %v435_v54 = vpop.f32.mrf.mxu2 }
  0xc9   : > { %v449_v55 = vpop.f32.mrf.mxu3  ;;  %v356_v56 = vpop.f32.mrf.mxu0 }
  0xca   : > { %v375_v57 = vpack.c.bf16 %v356_v56, %v354_v52  ;;  %v370_v58 = vpop.f32.mrf.mxu1 }
  0xcb   : > { %v376_v59 = vpack.c.bf16 %v370_v58, %v368_v53 }
  0xcc   : > { %511 = vmatpush.bf16.msrb.mxu2 %v375_v57 }
  0xcd   : > { %525 = vmatpush.bf16.msrb.mxu3 %v376_v59 }
  0xcf   : > { %920 = vmatmul.msk.bf16.vlgmr.msrb.gmra.mxu2 %vm464_vm1, %v981_v60 }
  0xd0   : > { %v437_v1 = vpop.f32.mrf.mxu2  ;;  %921 = vmatmul.msk.bf16.vlgmr.msrb.gmra.mxu3 %vm464_vm1, %v981_v60 }
  0xd1   : > { %v457_v3 = vpack.c.bf16 %v437_v1, %v435_v54  ;;  %v451_v4 = vpop.f32.mrf.mxu3 }
  0xd2   : > { %v458_v8 = vpack.c.bf16 %v451_v4, %v449_v55 }
  0xd3   : > { %475 = vmatpush.bf16.msrb.mxu0 %v457_v3 }
  0xd4   : > { %489 = vmatpush.bf16.msrb.mxu1 %v458_v8 }
  0xd6   : > { %914 = vmatmul.msk.bf16.vlgmr.msrb.gmra.mxu0 %vm464_vm1, %v990_v9 }
  0xd7   : > { %585 = vmatpush.bf16.msra.mxu0 %v949_v2  ;;  %915 = vmatmul.msk.bf16.vlgmr.msrb.gmra.mxu1 %vm464_vm1, %v990_v9 }
  0xd8   : > { %599 = vmatpush.bf16.msra.mxu1 %v953_v5 }
  0xdb   : > { %586 = vmatpush.bf16.msra.mxu0 %v941_v12 }
  0xdc   : > { %600 = vmatpush.bf16.msra.mxu1 %v945_v13 }
  0xdf   : > { %587 = vmatpush.bf16.msra.mxu0 %v933_v18 }
  0xe0   : > { %601 = vmatpush.bf16.msra.mxu1 %v937_v19 }
  0xe3   : > { %588 = vmatpush.bf16.msra.mxu0 %v925_v24 }
  0xe4   : > { %602 = vmatpush.bf16.msra.mxu1 %v929_v25 }
  0xe6   : > { %954 = vmatmul.msk.bf16.vlgmr.msra.gmra.mxu0 %vm341_vm0, %v1405_v51 }
  0xe7   : > { %955 = vmatmul.msk.bf16.vlgmr.msra.gmra.mxu1 %vm341_vm0, %v1405_v51 }
 0x152   : > { %v513_v37 = vpop.f32.mrf.mxu2 }
 0x153   : > { %v477_v26 = vpop.f32.mrf.mxu0  ;;  %v527_v38 = vpop.f32.mrf.mxu3 }
 0x154   : > { %v491_v27 = vpop.f32.mrf.mxu1  ;;  %v514_v43 = vadd.f32 %v513_v37, %v477_v26 }
 0x155   : > { %v528_v45 = vadd.f32 %v527_v38, %v491_v27 }
 0x15a   : > { %v515_v39 = vpop.f32.mrf.mxu2 }
 0x15b   : > { %v479_v28 = vpop.f32.mrf.mxu0  ;;  %v529_v40 = vpop.f32.mrf.mxu3 }
 0x15c   : > { %v493_v29 = vpop.f32.mrf.mxu1  ;;  %v516_v44 = vadd.f32 %v515_v39, %v479_v28 }
 0x15d   : > { %v530_v46 = vadd.f32 %v529_v40, %v493_v29 }
 0x163   : > { %v590_v30 = vpop.f32.mrf.mxu0 }
 0x164   : > { %v604_v31 = vpop.f32.mrf.mxu1 }
 0x16b   : > { %v592_v32 = vpop.f32.mrf.mxu0 }
 0x16c   : > { %v612_v33 = vpack.c.bf16 %v592_v32, %v590_v30  ;;  %v606_v34 = vpop.f32.mrf.mxu1 }
 0x16d   : > { %v613_v35 = vpack.c.bf16 %v606_v34, %v604_v31 }
 0x16e   : > { %629 = vmatpush.bf16.msra.mxu2 %v612_v33 }
 0x16f   : > { %643 = vmatpush.bf16.msra.mxu3 %v613_v35 }
 0x171   : > { %962 = vmatmul.msk.bf16.vlgmr.msra.gmra.mxu2 %vm464_vm1, %v999_v36 }
 0x172   : > { %963 = vmatmul.msk.bf16.vlgmr.msra.gmra.mxu3 %vm464_vm1, %v999_v36 }
 0x1f4   : > { %v631_v41 = vpop.f32.mrf.mxu2 }
 0x1f5   : > { %v645_v42 = vpop.f32.mrf.mxu3  ;;  %v650_v48 = vadd.f32 %v631_v41, %v514_v43 }
 0x1f6   : > { %v651_v51 = vadd.f32 %v645_v42, %v528_v45 }
 0x1fc   : > { %v633_v47 = vpop.f32.mrf.mxu2 }
 0x1fd   : > { %v652_v49 = vadd.f32 %v633_v47, %v516_v44  ;;  %v647_v50 = vpop.f32.mrf.mxu3 }
 0x1fe   : > { %v653_v52 = vadd.f32 %v647_v50, %v530_v46 }
 0x1ff   : > { %v654_v53 = vadd.f32 %v652_v49, %v650_v48 }
 0x200   : > { %v661_v54 = vadd.f32 %v653_v52, %v651_v51 }
 0x201   : > { %v655_v55 = vrot.slane %v654_v53, 4 }
 0x202   : > { %v662_v56 = vrot.slane %v661_v54, 4 }
 0x203   : > { %v656_v57 = vadd.f32 %v655_v55, %v654_v53 }
 0x204   : > { %v663_v58 = vadd.f32 %v662_v56, %v661_v54 }
 0x205   : > { %v657_v59 = vrot.slane %v656_v57, 2 }
 0x206   : > { %v664_v60 = vrot.slane %v663_v58, 2 }
 0x207   : > { %v658_v61 = vadd.f32 %v657_v59, %v656_v57 }
 0x208   : > { %v665_v62 = vadd.f32 %v664_v60, %v663_v58 }
 0x209   : > { %v659_v63 = vrot.slane %v658_v61, 1 }
 0x20a   : > { %v666_v0 = vrot.slane %v665_v62, 1 }
 0x20b   : > { %v660_v1 = vadd.f32 %v659_v63, %v658_v61 }
 0x20c   : > { %v667_v2 = vadd.f32 %v666_v0, %v665_v62 }
 0x20d   : > { %v668_v3 = vmul.f32 0.0625, %v660_v1 }
 0x20e   : > { %v669_v4 = vmul.f32 0.0625, %v667_v2 }
 0x20f   : > { %v670_v5 = vsub.f32 %v650_v48, %v668_v3  ;;  %v672_v6 = vsub.f32 %v652_v49, %v668_v3 }
 0x210   : > { %v671_v7 = vsub.f32 %v651_v51, %v669_v4  ;;  %v673_v8 = vsub.f32 %v653_v52, %v669_v4 }
 0x211   : > { %v674_v9 = vmul.f32 %v670_v5, %v670_v5  ;;  %v676_v10 = vmul.f32 %v672_v6, %v672_v6 }
 0x212   : > { %v675_v11 = vmul.f32 %v671_v7, %v671_v7  ;;  %v677_v12 = vmul.f32 %v673_v8, %v673_v8 }
 0x213   : > { %v678_v13 = vadd.f32 %v676_v10, %v674_v9 }
 0x214   : > { %v685_v14 = vadd.f32 %v677_v12, %v675_v11 }
 0x215   : > { %v679_v15 = vrot.slane %v678_v13, 4 }
 0x216   : > { %v686_v16 = vrot.slane %v685_v14, 4 }
 0x217   : > { %v680_v17 = vadd.f32 %v679_v15, %v678_v13 }
 0x218   : > { %v687_v18 = vadd.f32 %v686_v16, %v685_v14 }
 0x219   : > { %v681_v19 = vrot.slane %v680_v17, 2 }
 0x21a   : > { %v688_v20 = vrot.slane %v687_v18, 2 }
 0x21b   : > { %v682_v21 = vadd.f32 %v681_v19, %v680_v17 }
 0x21c   : > { %v689_v22 = vadd.f32 %v688_v20, %v687_v18 }
 0x21d   : > { %v683_v23 = vrot.slane %v682_v21, 1 }
 0x21e   : > { %v690_v24 = vrot.slane %v689_v22, 1 }
 0x21f   : > { %v684_v25 = vadd.f32 %v683_v23, %v682_v21 }
 0x220   : > { %v691_v26 = vadd.f32 %v690_v24, %v689_v22 }
 0x221   : > { %v693_v27 = vsel %vm692_vm2, %v660_v1, %v684_v25 }
 0x222   : > { %v694_v28 = vsel %vm692_vm2, %v667_v2, %v691_v26 }
 0x223   : > { %v697_v29 = vrot.slane %v694_v28, 6 }
 0x225   : > { %v699_v30 = vsel %vm698_vm3, %v693_v27, %v697_v29 }
 0x226   : > { %701 = vst [vmem:[%s278_s17] sm:$0xf] %v699_v30 }
 0x227   : > { %1159 = shalt.err (!%p1156_p1)
}
 0x228   : > { %1006 = dma.vmem_to_hbm [thread:$0]  (%p1350_p10), %s719_s18, 64, %s721_s29, %s703_s2  }
 0x229 PF: > { %p1018_p2 = scmp.ge.s32.totalorder %s1246_s21, 2  ;;  %s732_s4 = sand.u32 1, %s1210_s12  }
 0x22a   : > { %s733_s11 = scalar_lea.sflag [#allocation5], %s732_s4 }
 0x22b   : > { %p1013_p4 = pnand %p1018_p2, %p1358_p13 }
 0x22d   : > { %p1014_p5 = pneg %p1013_p4 }
 0x22f   : > { %1205 = dma.done.wait (%p1014_p5), %s733_s11, 64  }
 0x230   : > { %1207 = vsyncadd (%p1014_p5), %s733_s11, 4294967232  ;;  %s17_s21 = sadd.s32 1, %s1246_s21   ;;  %s1493_s6 = sld [smem:[#allocation9_spill]] }
 0x231   : > { %p14_p6 = scmp.ge.s32.totalorder %s17_s21, 6   ;;  %s1494_s26 = sld [smem:[#allocation10_spill]] }
 0x232   : > { %s1495_s12 = smov %s1214_s13  ;;  %s1496_s13 = smov %s1218_s14 }
 0x233   : > { %s1497_s14 = smov %s1356_s7  ;;  %s1498_s15 = smov %s1226_s16 }
 0x234   : > { %s1499_s16 = smov %s1344_s30  ;;  %s1500_s17 = smov %s1238_s19 }
 0x235   : > { %s1501_s18 = smov %s1242_s20  ;;  %16 = sbr.rel (!%p14_p6) target bundleno = 9 (0x9), region = 125 }
 0x236   : > { %s1502_s19 = smov %s1493_s6 }
 0x237   : > { %s1503_s20 = smov %s1494_s26 }
 0x23a   :  { %739 = vsyncpa [#allocation4], 1 }
 0x23b   :  { %741 = vsyncpa [#allocation4 + $0x1], 1 }
 0x23c   :  { %742 = vsyncpa [#allocation5], 1 }
 0x23d   :  { %744 = vsyncpa [#allocation5 + $0x1], 1 }

</bundles_post_ra>
